<compile_context>
chip_gen: v7x
topology: tpu7x:2x2x1
jax: 0.10.0
libtpu: 0.0.40
codegen_flags: <defaults>
</compile_context>

<pallas_src>
import numpy as np
import jax
import jax.numpy as jnp
from jax import lax
from jax.experimental import pallas as pl
from jax.experimental.pallas import tpu as pltpu


def _make_nloss_kernel(tile_rows, lanes, rows_valid, needs_mask):
    """Kernel over one (tile_rows, lanes) slab of each input; emits an (8, lanes) partial."""

    def kernel(x_ref, y_ref, b_ref, out_ref):
        sq_b = b_ref[...]
        # 0.5*(y-x)^2*sq_b^2 == 0.5*((y-x)*sq_b)^2   (saves a multiply)
        z = (y_ref[...] - x_ref[...]) * sq_b
        # 0.5*log(sq_b^2) == log|sq_b|               (saves a multiply + square)
        term = jnp.log(jnp.abs(sq_b)) - 0.5 * (z * z)
        if needs_mask:
            # Last grid step's block extends past the array; zero the OOB rows.
            row0 = pl.program_id(0) * tile_rows
            row_idx = lax.broadcasted_iota(jnp.int32, term.shape, 0) + row0
            term = jnp.where(row_idx < rows_valid, term, jnp.float32(0.0))
        # Vreg-aligned partial reduction: collapse sublane-groups of 8 rows with
        # plain vector adds (no cross-lane XLU traffic inside the kernel).
        out_ref[...] = jnp.sum(term.reshape(tile_rows // 8, 8, lanes), axis=0)

    return kernel


def _nloss_gd_impl(x, y, sq_beta, *, tile_rows=2048, lanes=128):
    """Forward pass of Nloss_GD. x, y, sq_beta: [N, D] float32. Returns scalar E."""
    N, D = x.shape
    assert y.shape == (N, D) and sq_beta.shape == (N, D)
    total = N * D

    xf = x.reshape(-1)
    yf = y.reshape(-1)
    bf = sq_beta.reshape(-1)

    if total % lanes != 0:
        # TODO(synk): totals not divisible by 128 take a small concat-pad copy here;
        # a fully copy-free path would need a separate 1-D-blocked tail kernel.
        pad = lanes - (total % lanes)
        # Padding contributes exactly zero: log|1| - 0.5*((0-0)*1)^2 == 0.
        xf = jnp.concatenate([xf, jnp.zeros((pad,), xf.dtype)])
        yf = jnp.concatenate([yf, jnp.zeros((pad,), yf.dtype)])
        bf = jnp.concatenate([bf, jnp.ones((pad,), bf.dtype)])

    rows = xf.shape[0] // lanes          # data-bearing rows of the [rows, 128] view
    x2 = xf.reshape(rows, lanes)         # free reshape (row-major, no copy)
    y2 = yf.reshape(rows, lanes)
    b2 = bf.reshape(rows, lanes)

    # Tile sizing:
    #  * 2048 rows -> 1 MiB per input per buffer; 3 inputs double-buffered = 6 MiB,
    #    well inside scoped VMEM on v5e/v6e/v7x (limit raised explicitly below).
    #  * if everything fits in one tile, split into (at least) two grid steps so
    #    v7x's two TensorCores each stream half the HBM traffic.
    tile_rows = int(tile_rows)
    if rows <= tile_rows:
        half = -(-rows // 2)
        tile_rows = max(8, ((half + 7) // 8) * 8)
    num_tiles = -(-rows // tile_rows)
    needs_mask = (num_tiles * tile_rows) != rows   # last block partially out-of-bounds

    kernel = _make_nloss_kernel(tile_rows, lanes, rows, needs_mask)

    elems = rows * lanes
    cost = pl.CostEstimate(
        flops=8 * elems,
        transcendentals=elems,
        bytes_accessed=3 * elems * 4 + num_tiles * 8 * lanes * 4,
    )

    partials = pl.pallas_call(
        kernel,
        out_shape=jax.ShapeDtypeStruct((num_tiles * 8, lanes), jnp.float32),
        grid_spec=pltpu.PrefetchScalarGridSpec(
            num_scalar_prefetch=0,
            grid=(num_tiles,),
            in_specs=[
                pl.BlockSpec((tile_rows, lanes), lambda i: (i, 0)),
                pl.BlockSpec((tile_rows, lanes), lambda i: (i, 0)),
                pl.BlockSpec((tile_rows, lanes), lambda i: (i, 0)),
            ],
            out_specs=pl.BlockSpec((8, lanes), lambda i: (i, 0)),
        ),
        compiler_params=pltpu.CompilerParams(
            # Independent output block per grid step -> fully parallel
            # (lets v7x shard the grid across both TensorCores).
            dimension_semantics=("parallel",),
            vmem_limit_bytes=32 * 1024 * 1024,
        ),
        cost_estimate=cost,
    )(x2, y2, b2)

    # Glue: final tiny reduction, constant normalization term, mean over batch.
    total_loglik = jnp.sum(partials)
    norm_term = jnp.float32(0.5 * np.log(2.0 * np.pi) * D)
    return -total_loglik / N + norm_term


# jit the whole wrapper: the reshape / partial-sum glue is fused and dispatched once.
nloss_gd = jax.jit(_nloss_gd_impl, static_argnames=("tile_rows", "lanes"))


def _reference(x, y, sq_beta):
    beta = sq_beta ** 2
    log_det = 0.5 * jnp.sum(jnp.log(beta), axis=1)
    exponent = jnp.sum(-0.5 * (y - x) ** 2 * beta, axis=1)
    dim = x.shape[1]
    log_p = log_det + exponent - 0.5 * np.log(2.0 * np.pi) * dim
    return jnp.sum(-log_p) / x.shape[0]


if __name__ == "__main__":
    # Small deterministic example: N=64 samples, dim=32 features.
    key = jax.random.PRNGKey(0)
    kx, ky, kb = jax.random.split(key, 3)
    N, D = 64, 32
    x = jax.random.normal(kx, (N, D), dtype=jnp.float32)
    y = jax.random.normal(ky, (N, D), dtype=jnp.float32)
    # sq_Beta (the module squares it internally); keep away from zero so log() is finite.
    sq_beta = 0.5 + jax.random.uniform(kb, (N, D), dtype=jnp.float32)

    out = jax.block_until_ready(nloss_gd(x, y, sq_beta))
    ref = jax.block_until_ready(_reference(x, y, sq_beta))
    assert jnp.allclose(out, ref, rtol=1e-5, atol=1e-5), (out, ref)
    print("KERNEL_OK")
</pallas_src>

<mosaic_0001>
module attributes {stable_mosaic.version = 11 : i64} {
  func.func @kernel(%arg0: i32, %arg1: memref<8x128xf32, #tpu.memory_space<vmem>>, %arg2: memref<8x128xf32, #tpu.memory_space<vmem>>, %arg3: memref<8x128xf32, #tpu.memory_space<vmem>>, %arg4: memref<8x128xf32, #tpu.memory_space<vmem>>) attributes {dimension_semantics = [#tpu.dimension_semantics<parallel>], iteration_bounds = array<i64: 2>, scalar_prefetch = 0 : i64, scratch_operands = 0 : i64, tpu.core_type = #tpu.core_type<tc>, window_params = [{transform_indices = @transform_0, window_bounds = array<i64: 8, 128>}, {transform_indices = @transform_1, window_bounds = array<i64: 8, 128>}, {transform_indices = @transform_2, window_bounds = array<i64: 8, 128>}, {transform_indices = @transform_3, window_bounds = array<i64: 8, 128>}]} {
    %c0 = arith.constant 0 : index
    %c0_0 = arith.constant 0 : index
    %0 = vector.load %arg3[%c0, %c0_0] : memref<8x128xf32, #tpu.memory_space<vmem>>, vector<8x128xf32>
    %c0_1 = arith.constant 0 : index
    %c0_2 = arith.constant 0 : index
    %1 = vector.load %arg2[%c0_1, %c0_2] : memref<8x128xf32, #tpu.memory_space<vmem>>, vector<8x128xf32>
    %c0_3 = arith.constant 0 : index
    %c0_4 = arith.constant 0 : index
    %2 = vector.load %arg1[%c0_3, %c0_4] : memref<8x128xf32, #tpu.memory_space<vmem>>, vector<8x128xf32>
    %3 = arith.subf %1, %2 : vector<8x128xf32>
    %4 = arith.mulf %3, %0 : vector<8x128xf32>
    %5 = math.absf %0 : vector<8x128xf32>
    %6 = math.log %5 : vector<8x128xf32>
    %7 = arith.mulf %4, %4 : vector<8x128xf32>
    %cst = arith.constant 5.000000e-01 : f32
    %8 = vector.broadcast %cst : f32 to vector<8x128xf32>
    %9 = arith.mulf %8, %7 : vector<8x128xf32>
    %10 = arith.subf %6, %9 : vector<8x128xf32>
    %11 = vector.shape_cast %10 : vector<8x128xf32> to vector<1x8x128xf32>
    %cst_5 = arith.constant dense<0.000000e+00> : vector<8x128xf32>
    %12 = vector.multi_reduction <add>, %11, %cst_5 [0] : vector<1x8x128xf32> to vector<8x128xf32>
    %c0_6 = arith.constant 0 : index
    %c0_7 = arith.constant 0 : index
    %13 = vector.load %arg4[%c0_6, %c0_7] : memref<8x128xf32, #tpu.memory_space<vmem>>, vector<8x128xf32>
    tpu.vector_store %arg4[%c0_6, %c0_7], %12 {strides = array<i32>} : memref<8x128xf32, #tpu.memory_space<vmem>>, vector<8x128xf32>,
    return
  }
  func.func @transform_0(%arg0: i32) -> (i32, i32) {
    %c0_i32 = arith.constant 0 : i32
    %c0_i32_0 = arith.constant 0 : i32
    return %arg0, %c0_i32 : i32, i32
  }
  func.func @transform_1(%arg0: i32) -> (i32, i32) {
    %c0_i32 = arith.constant 0 : i32
    %c0_i32_0 = arith.constant 0 : i32
    return %arg0, %c0_i32 : i32, i32
  }
  func.func @transform_2(%arg0: i32) -> (i32, i32) {
    %c0_i32 = arith.constant 0 : i32
    %c0_i32_0 = arith.constant 0 : i32
    return %arg0, %c0_i32 : i32, i32
  }
  func.func @transform_3(%arg0: i32) -> (i32, i32) {
    %c0_i32 = arith.constant 0 : i32
    %c0_i32_0 = arith.constant 0 : i32
    return %arg0, %c0_i32 : i32, i32
  }
}

</mosaic_0001>

<bundles_post_ra>
// kernel: _nloss_gd_impl.1
= control target key start
LH: loop header
LB: loop body
LE: loop exit
PB: predicated region body
PF: predicated region fallthrough
CT: control target
= control target key end

     0   :  { %s339_s12 = smov 0   ;;  %s362_s0 = inlined_call_operand.vmem [shape: f32[16,128], index: 0, kind: input, shape index: {}]   ;;  %s363_s1 = inlined_call_operand.vmem [shape: f32[16,128], index: 1, kind: input, shape index: {}]   ;;  %s364_s2 = inlined_call_operand.vmem [shape: f32[16,128], index: 2, kind: input, shape index: {}]   ;;  %s365_s3 = inlined_call_operand.vmem [shape: f32[16,128], index: 3, kind: output, shape index: {}]  }
   0x1 LB: > { %s290_s13 = sadd.s32 4294967295, %s317_s12   ;;  %p294_p0 = scmp.ge.s32.totalorder %s317_s12, 1  ;;  %s317_s12 = sphi %s339_s12, %s13_s12  }
   0x2   : > { %p154_p1 = scmp.lt.s32.totalorder %s317_s12, 3 }
   0x4   : > { %p155_p2 = pnand %p294_p0, %p154_p1 }
   0x5   : > { %p184_p3 = scmp.lt.s32.totalorder (!%p155_p2), %s290_s13, 1 }
   0x6   : > { %158 = sbr.rel (%p155_p2) target bundleno = 37 (0x25), region = 32 }
   0xd   : > { %s367_s13 = smov (!%p184_p3, %s290_s13), 1 }
   0xe   : > { %s295_s14 = sshll.u32 %s367_s13, 3 }
   0xf   : > { %s187_s17 = scalar_lea.vmem %s362_s0, %s295_s14  ;;  %s191_s20 = scalar_lea.vmem %s363_s1, %s295_s14 }
  0x10   : > { %s195_s23 = scalar_lea.vmem %s364_s2, %s295_s14  ;;  %v201_v0 = vld [vmem:[%s191_s20] sm:$0xff]  ;;  %s199_s26 = scalar_lea.vmem %s365_s3, %s295_s14 }
  0x11   : > { %v202_v1 = vld [vmem:[%s187_s17] sm:$0xff] }
  0x12   : > { %v200_v2 = vld [vmem:[%s195_s23] sm:$0xff]  ;;  %v203_v3 = vsub.f32 %v201_v0, %v202_v1 }
  0x13   : > { %v205_v4 = vand.u32 2147483647, %v200_v2 }
  0x14   : > { %v204_v5 = vmul.f32 %v203_v3, %v200_v2 }
  0x15   : > { %309 = vlog2.f32 %v205_v4 }
  0x16   : > { %v208_v6 = vmul.f32 %v204_v5, %v204_v5 }
  0x18   : > { %v209_v7 = vmul.f32 0.5, %v208_v6 }
  0x1f   : > { %v310_v8 = vpop.eup %309 }
  0x20   : > { %v207_v9 = vmul.f32 0.6931472, %v310_v8 }
  0x22   : > { %v210_v10 = vsub.f32 %v207_v9, %v209_v7 }
  0x24   : > { %212 = vst [vmem:[%s199_s26] sm:$0xff] %v210_v10 }
  0x25 PF: > { %s13_s12 = sadd.s32 1, %s317_s12  }
  0x26   : > { %p10_p4 = scmp.ge.s32.totalorder %s13_s12, 4  }
  0x28   :  { %12 = sbr.rel (!%p10_p4) target bundleno = 1 (0x1), region = 68 }

</bundles_post_ra>
